<compile_context>
chip_gen: v5e
topology: v5e:2x2
jax: 0.10.0
libtpu: 0.0.40
codegen_flags: <defaults>
</compile_context>

<pallas_src>
import math

import jax
import jax.numpy as jnp
from jax.experimental import pallas as pl
from jax.experimental.pallas import tpu as pltpu


def _round_up(a: int, m: int) -> int:
    return ((a + m - 1) // m) * m


def _gated_kernel_packed(x_ref, r_ref, w_ref, m_ref, o_ref):
    # x_ref, r_ref, o_ref: (tr, Dg); w_ref: (2, Dg) f32; m_ref: (Dg, Dg) f32 block-diagonal.
    x = x_ref[...]
    r = r_ref[...]
    w = w_ref[...]
    xf = x.astype(jnp.float32)
    rf = r.astype(jnp.float32)
    # Per-lane contribution to the gate logit (folded 3-way-concat matvec).
    p = xf * w[0:1, :] + rf * w[1:2, :]                     # (tr, Dg)
    # Segmented reduce + broadcast back per group in a single MXU matmul.
    logits = jnp.dot(p, m_ref[...],
                     precision=jax.lax.Precision.HIGHEST,
                     preferred_element_type=jnp.float32)    # (tr, Dg)
    gate = jax.nn.sigmoid(logits)
    # out = x*gate + r*(1-gate) == r + (x - r)*gate, blended in the input dtype.
    o_ref[...] = (r + (x - r) * gate.astype(x.dtype)).astype(o_ref.dtype)


def _gated_kernel_flat(x_ref, r_ref, w_ref, o_ref):
    # Unpacked path (D >= 128 or packing not beneficial): one logit per row.
    x = x_ref[...]
    r = r_ref[...]
    w = w_ref[...]
    xf = x.astype(jnp.float32)
    rf = r.astype(jnp.float32)
    p = xf * w[0:1, :] + rf * w[1:2, :]                     # (tr, D)
    logit = jnp.sum(p, axis=-1, keepdims=True)              # (tr, 1) — XLU reduce (idle slot)
    gate = jax.nn.sigmoid(logit)
    o_ref[...] = (r + (x - r) * gate.astype(x.dtype)).astype(o_ref.dtype)


def gated_residual(x, res, weight, *, target_block_bytes=4 << 20, min_grid_steps=8):
    """x, res: [..., D]; weight: (1, 3*D) as in nn.Linear(dim*3, 1, bias=False)."""
    orig_shape = x.shape
    D = int(orig_shape[-1])
    out_dtype = x.dtype
    itemsize = jnp.dtype(out_dtype).itemsize

    xf = x.reshape(-1, D)
    rf = res.reshape(-1, D)
    N = xf.shape[0]

    # Fold the three weight vectors [w_x ; w_res ; w_diff] into two effective ones.
    w3 = weight.reshape(3, D).astype(jnp.float32)
    w_eff_x = w3[0] + w3[2]
    w_eff_r = w3[1] - w3[2]

    # Lane packing: pack g rows along the 128-lane axis when D < 128.
    if D < 128:
        g = 128 // math.gcd(D, 128)
        if g * D > 512:          # cap the block-diagonal matrix / packed width
            g = 1
    else:
        g = 1
    Dg = g * D

    # Pad rows only to a multiple of g (needed for the metadata-only packing
    # reshape); at most g-1 rows, and nothing at all when N % g == 0.
    N_pad = _round_up(max(N, 1), g)
    padded = N_pad != N
    if padded:
        pad = N_pad - N
        xf = jnp.pad(xf, ((0, pad), (0, 0)))
        rf = jnp.pad(rf, ((0, pad), (0, 0)))
    Ng = N_pad // g
    xg = xf.reshape(Ng, Dg)      # contiguous row-major view, no copy
    rg = rf.reshape(Ng, Dg)

    # Folded weights tiled across the g packed groups: (2, Dg).
    w2 = jnp.stack([jnp.tile(w_eff_x, g), jnp.tile(w_eff_r, g)], axis=0)

    # D/dtype-aware row tile: byte budget per block, but keep >= min_grid_steps
    # grid steps (v7x megacore sharding) and never exceed the array.
    target_block_bytes = min(int(target_block_bytes), 6 << 20)
    tr_budget = max(16, (target_block_bytes // (Dg * itemsize)) // 16 * 16)
    tr_steps = max(16, _round_up(pl.cdiv(Ng, min_grid_steps), 16))
    tr = min(tr_budget, tr_steps)
    if tr >= Ng:
        tr = Ng                  # single block; block dims == full array dims
    grid = (pl.cdiv(Ng, tr),)

    in_arrays = [xg, rg, w2]
    in_specs = [
        pl.BlockSpec((tr, Dg), lambda i: (i, 0)),
        pl.BlockSpec((tr, Dg), lambda i: (i, 0)),
        # Constant block index -> fetched once, resident across all grid steps.
        pl.BlockSpec((2, Dg), lambda i: (0, 0)),
    ]
    if g > 1:
        gid = jnp.arange(Dg, dtype=jnp.int32) // D
        m_blockdiag = (gid[:, None] == gid[None, :]).astype(jnp.float32)  # (Dg, Dg)
        in_arrays.append(m_blockdiag)
        in_specs.append(pl.BlockSpec((Dg, Dg), lambda i: (0, 0)))
        kernel = _gated_kernel_packed
    else:
        kernel = _gated_kernel_flat

    block_bytes = tr * Dg * itemsize
    aux_bytes = 2 * 2 * Dg * 4 + (2 * Dg * Dg * 4 if g > 1 else 0)
    # 3 streams x 2 pipeline buffers + resident weight/mask blocks + margin.
    vmem_limit = int(min(max(6 * block_bytes + aux_bytes + (4 << 20), 16 << 20), 48 << 20))

    matmul_flops = 2 * Ng * Dg * Dg if g > 1 else 2 * Ng * Dg
    cost = pl.CostEstimate(
        flops=int(6 * Ng * Dg + matmul_flops),
        transcendentals=int(Ng * (Dg if g > 1 else 1)),
        bytes_accessed=int(3 * Ng * Dg * itemsize + aux_bytes),
    )

    out = pl.pallas_call(
        kernel,
        out_shape=jax.ShapeDtypeStruct((Ng, Dg), out_dtype),
        grid_spec=pltpu.PrefetchScalarGridSpec(
            num_scalar_prefetch=0,
            grid=grid,
            in_specs=in_specs,
            out_specs=pl.BlockSpec((tr, Dg), lambda i: (i, 0)),
        ),
        compiler_params=pltpu.CompilerParams(
            dimension_semantics=("parallel",),
            vmem_limit_bytes=vmem_limit,
        ),
        cost_estimate=cost,
    )(*in_arrays)

    out = out.reshape(N_pad, D)
    if padded:
        out = out[:N]
    return out.reshape(orig_shape)


def gated_residual_ref(x, res, weight):
    """Pure-JAX reference mirroring the PyTorch forward exactly (full f32 matmul)."""
    gate_input = jnp.concatenate([x, res, x - res], axis=-1)
    logit = jnp.matmul(gate_input, weight.reshape(1, -1).T,
                       precision=jax.lax.Precision.HIGHEST)  # (..., 1)
    gate = jax.nn.sigmoid(logit)
    return x * gate + res * (1.0 - gate)


def _check(key, shape):
    D = shape[-1]
    kx, kr, kw = jax.random.split(key, 3)
    x = jax.random.normal(kx, shape, dtype=jnp.float32)
    res = jax.random.normal(kr, shape, dtype=jnp.float32)
    # nn.Linear(dim*3, 1, bias=False).weight has shape (1, 3*dim)
    weight = jax.random.normal(kw, (1, 3 * D), dtype=jnp.float32) * 0.1

    out = jax.block_until_ready(gated_residual(x, res, weight))
    ref = gated_residual_ref(x, res, weight)
    assert out.shape == ref.shape == shape
    assert jnp.allclose(out, ref, atol=1e-5, rtol=1e-5), f"mismatch vs reference for {shape}"


if __name__ == "__main__":
    key = jax.random.PRNGKey(0)
    ks = jax.random.split(key, 6)

    _check(ks[0], (2, 8, 32))       # packed path (g=4, Dg=128), single block
    _check(ks[1], (3, 7, 32))       # ragged N -> tiny pad to a multiple of g only
    _check(ks[2], (4, 2048, 32))    # multi-step pipelined grid, packed path
    _check(ks[3], (5, 100, 32))     # non-dividing grid -> partial final row block
    _check(ks[4], (2, 8, 48))       # generalized packing (g=8, Dg=384)
    _check(ks[5], (2, 16, 128))     # flat path (D >= 128), 2-step grid

    print("KERNEL_OK")
</pallas_src>

<mosaic_0001>
module attributes {stable_mosaic.version = 11 : i64} {
  func.func @_gated_kernel_packed(%arg0: i32, %arg1: memref<4x128xf32, #tpu.memory_space<vmem>>, %arg2: memref<4x128xf32, #tpu.memory_space<vmem>>, %arg3: memref<2x128xf32, #tpu.memory_space<vmem>>, %arg4: memref<128x128xf32, #tpu.memory_space<vmem>>, %arg5: memref<4x128xf32, #tpu.memory_space<vmem>>) attributes {dimension_semantics = [#tpu.dimension_semantics<parallel>], iteration_bounds = array<i64: 1>, scalar_prefetch = 0 : i64, scratch_operands = 0 : i64, tpu.core_type = #tpu.core_type<tc>, window_params = [{transform_indices = @transform_0, window_bounds = array<i64: 4, 128>}, {transform_indices = @transform_1, window_bounds = array<i64: 4, 128>}, {pipeline_mode = #tpu.pipeline_mode<synchronous>, transform_indices = @transform_2, window_bounds = array<i64: 2, 128>}, {pipeline_mode = #tpu.pipeline_mode<synchronous>, transform_indices = @transform_3, window_bounds = array<i64: 128, 128>}, {transform_indices = @transform_4, window_bounds = array<i64: 4, 128>}]} {
    %c0 = arith.constant 0 : index
    %c0_0 = arith.constant 0 : index
    %0 = vector.load %arg1[%c0, %c0_0] : memref<4x128xf32, #tpu.memory_space<vmem>>, vector<4x128xf32>
    %c0_1 = arith.constant 0 : index
    %c0_2 = arith.constant 0 : index
    %1 = vector.load %arg2[%c0_1, %c0_2] : memref<4x128xf32, #tpu.memory_space<vmem>>, vector<4x128xf32>
    %c0_3 = arith.constant 0 : index
    %c0_4 = arith.constant 0 : index
    %2 = vector.load %arg3[%c0_3, %c0_4] : memref<2x128xf32, #tpu.memory_space<vmem>>, vector<2x128xf32>
    %3 = vector.extract_strided_slice %2 {offsets = [0, 0], sizes = [1, 128], strides = [1, 1]} : vector<2x128xf32> to vector<1x128xf32>
    %4 = vector.broadcast %3 : vector<1x128xf32> to vector<4x128xf32>
    %5 = arith.mulf %0, %4 : vector<4x128xf32>
    %6 = vector.extract_strided_slice %2 {offsets = [1, 0], sizes = [1, 128], strides = [1, 1]} : vector<2x128xf32> to vector<1x128xf32>
    %7 = vector.broadcast %6 : vector<1x128xf32> to vector<4x128xf32>
    %8 = arith.mulf %1, %7 : vector<4x128xf32>
    %9 = arith.addf %5, %8 : vector<4x128xf32>
    %c0_5 = arith.constant 0 : index
    %c0_6 = arith.constant 0 : index
    %10 = vector.load %arg4[%c0_5, %c0_6] : memref<128x128xf32, #tpu.memory_space<vmem>>, vector<128x128xf32>
    %cst = arith.constant dense<0.000000e+00> : vector<4x128xf32>
    %11 = tpu.matmul %9, %10, %cst {dimension_numbers = #tpu.dot_dimension_numbers<[1], [0], [0], [1], [0, 0, 1, 1], [], []>, precision = #tpu.contract_precision<fp32>} : vector<4x128xf32>, vector<128x128xf32>, vector<4x128xf32> -> vector<4x128xf32>
    %12 = arith.negf %11 : vector<4x128xf32>
    %13 = math.exp %12 : vector<4x128xf32>
    %cst_7 = arith.constant 1.000000e+00 : f32
    %14 = vector.broadcast %cst_7 : f32 to vector<4x128xf32>
    %15 = arith.addf %14, %13 : vector<4x128xf32>
    %16 = arith.divf %14, %15 : vector<4x128xf32>
    %17 = arith.subf %0, %1 : vector<4x128xf32>
    %18 = arith.mulf %17, %16 : vector<4x128xf32>
    %19 = arith.addf %1, %18 : vector<4x128xf32>
    %c0_8 = arith.constant 0 : index
    %c0_9 = arith.constant 0 : index
    %20 = vector.load %arg5[%c0_8, %c0_9] : memref<4x128xf32, #tpu.memory_space<vmem>>, vector<4x128xf32>
    tpu.vector_store %arg5[%c0_8, %c0_9], %19 {strides = array<i32>} : memref<4x128xf32, #tpu.memory_space<vmem>>, vector<4x128xf32>,
    return
  }
  func.func @transform_0(%arg0: i32) -> (i32, i32) {
    %c0_i32 = arith.constant 0 : i32
    %c0_i32_0 = arith.constant 0 : i32
    return %arg0, %c0_i32 : i32, i32
  }
  func.func @transform_1(%arg0: i32) -> (i32, i32) {
    %c0_i32 = arith.constant 0 : i32
    %c0_i32_0 = arith.constant 0 : i32
    return %arg0, %c0_i32 : i32, i32
  }
  func.func @transform_2(%arg0: i32) -> (i32, i32) {
    %c0_i32 = arith.constant 0 : i32
    %c0_i32_0 = arith.constant 0 : i32
    %c0_i32_1 = arith.constant 0 : i32
    return %c0_i32, %c0_i32_0 : i32, i32
  }
  func.func @transform_3(%arg0: i32) -> (i32, i32) {
    %c0_i32 = arith.constant 0 : i32
    %c0_i32_0 = arith.constant 0 : i32
    %c0_i32_1 = arith.constant 0 : i32
    return %c0_i32, %c0_i32_0 : i32, i32
  }
  func.func @transform_4(%arg0: i32) -> (i32, i32) {
    %c0_i32 = arith.constant 0 : i32
    %c0_i32_0 = arith.constant 0 : i32
    return %arg0, %c0_i32 : i32, i32
  }
}

</mosaic_0001>

<bundles_post_ra>
// kernel: tpu_custom_call.1
= control target key start
LH: loop header
LB: loop body
LE: loop exit
PB: predicated region body
PF: predicated region fallthrough
CT: control target
= control target key end

     0   :  { %9 = vsyncpa [#allocation3], 0  ;;  %s916_s0 = inlined_call_operand.hbm [shape: f32[4,128], index: 0, kind: input, shape index: {}]   ;;  %s917_s1 = inlined_call_operand.hbm [shape: f32[4,128], index: 1, kind: input, shape index: {}]   ;;  %s918_s2 = inlined_call_operand.hbm [shape: f32[2,128], index: 2, kind: input, shape index: {}]   ;;  %s919_s3 = inlined_call_operand.hbm [shape: f32[128,128], index: 3, kind: input, shape index: {}]   ;;  %s920_s4 = inlined_call_operand.hbm [shape: f32[4,128], index: 4, kind: output, shape index: {}]  }
   0x1   :  { %10 = vsyncpa [#allocation6], 0 }
   0x2   :  { %11 = vsyncpa [#allocation9], 0  ;;  %s29_s17 = sshll.u32 %s917_s1, 4  ;;  %s30_s17 = int_to_ptr.hbm [resolvable:$true] %s29_s17 }
   0x3   :  { %12 = vsyncpa [#allocation4], 0  ;;  %s622_s18 = smov [#allocation5]   ;;  %s18_s22 = sshll.u32 %s916_s0, 4  ;;  %s19_s22 = int_to_ptr.hbm [resolvable:$true] %s18_s22 }
   0x4   :  { %s31_s19 = sshll.u32 %s622_s18, 4  ;;  %s623_s23 = smov [#allocation2]   ;;  %s32_s19 = int_to_ptr.vmem [resolvable:$true] %s31_s19 }
   0x5   :  { %34 = dma.hbm_to_vmem [thread:$0]  %s30_s17, 64, %s32_s19, [#allocation6]  }
   0x6   :  { %s20_s24 = sshll.u32 %s623_s23, 4  ;;  %s40_s27 = sshll.u32 %s918_s2, 4  ;;  %s21_s24 = int_to_ptr.vmem [resolvable:$true] %s20_s24  ;;  %s41_s27 = int_to_ptr.hbm [resolvable:$true] %s40_s27 }
   0x7   :  { %23 = dma.hbm_to_vmem [thread:$0]  %s19_s22, 64, %s21_s24, [#allocation3]  }
   0x8   :  { %s50_s29 = sshll.u32 %s919_s3, 4  ;;  %s624_s30 = smov [#allocation7]   ;;  %s51_s29 = int_to_ptr.hbm [resolvable:$true] %s50_s29 }
   0x9   :  { %s42_s5 = sshll.u32 %s624_s30, 4  ;;  %s625_s0 = smov [#allocation8]   ;;  %s43_s5 = int_to_ptr.vmem [resolvable:$true] %s42_s5 }
   0xa   :  { %45 = dma.hbm_to_vmem [thread:$0]  %s41_s27, 32, %s43_s5, [#allocation6]  }
   0xb   :  { %s52_s6 = sshll.u32 %s625_s0, 4  ;;  %s626_s7 = smov 128   ;;  %s53_s6 = int_to_ptr.vmem [resolvable:$true] %s52_s6 }
   0xc   :  { %s627_s8 = smov 8  }
   0xd   :  { %58 = dma.hbm_to_vmem [thread:$0]  %s51_s29, 2048, %s53_s6, [#allocation9], %s626_s7, %s626_s7, %s627_s8  }
   0xe   :  { %614 = dma.done.wait [#allocation3], 64  }
   0xf   :  { %615 = vsyncadd [#allocation3], 4294967232 }
  0x10   :  { %616 = dma.done.wait [#allocation6], 96  }
  0x11   :  { %617 = vsyncadd [#allocation6], 4294967200 }
  0x12   :  { %618 = dma.done.wait [#allocation9], 2048  }
  0x13   :  { %619 = vsyncadd [#allocation9], 4294965248  ;;  %v98_v0 = vld [vmem:[#allocation8 + $0x78] sm:$0xff]  ;;  %v97_v1 = vld [vmem:[#allocation8 + $0x70] sm:$0xff]  ;;  %s628_s2 = smov [#allocation10]   ;;  %s470_s11 = sshll.u32 %s920_s4, 4  ;;  %s471_s11 = int_to_ptr.hbm [resolvable:$true] %s470_s11 }
  0x14   :  { %v96_v2 = vld [vmem:[#allocation8 + $0x68] sm:$0xff]  ;;  %v666_v3 = vand.u32 4294901760, %v98_v0  ;;  %v668_v4 = vand.u32 4294901760, %v97_v1  ;;  %v95_v6 = vld [vmem:[#allocation8 + $0x60] sm:$0xff]  ;;  %v94_v7 = vld [vmem:[#allocation8 + $0x58] sm:$0xff]  ;;  %s468_s3 = sshll.u32 %s628_s2, 4  ;;  %s469_s3 = int_to_ptr.vmem [resolvable:$true] %s468_s3 }
  0x15   :  { %v670_v5 = vand.u32 4294901760, %v96_v2  ;;  %v93_v8 = vld [vmem:[#allocation8 + $0x50] sm:$0xff]  ;;  %v672_v9 = vand.u32 4294901760, %v95_v6  ;;  %v674_v10 = vand.u32 4294901760, %v94_v7  ;;  %v92_v12 = vld [vmem:[#allocation8 + $0x48] sm:$0xff]  ;;  %v91_v13 = vld [vmem:[#allocation8 + $0x40] sm:$0xff] }
  0x16   :  { %v676_v11 = vand.u32 4294901760, %v93_v8  ;;  %100 = vmatpush.msra.mxu0 %v666_v3  ;;  %v680_v14 = vsub.f32 %v98_v0, %v666_v3  ;;  %v683_v15 = vsub.f32 %v97_v1, %v668_v4  ;;  %v688_v17 = vand.u32 4294901760, %v92_v12  ;;  %v90_v18 = vld [vmem:[#allocation8 + $0x38] sm:$0xff]  ;;  %296 = vmatpush.msra.mxu3 %v666_v3  ;;  %v89_v26 = vld [vmem:[#allocation8 + $0x30] sm:$0xff]  ;;  %v88_v36 = vld [vmem:[#allocation8 + $0x28] sm:$0xff] }
  0x17   :  { %v686_v16 = vsub.f32 %v96_v2, %v670_v5  ;;  %v692_v19 = vsub.f32 %v95_v6, %v672_v9  ;;  %v695_v20 = vsub.f32 %v94_v7, %v674_v10  ;;  %v704_v25 = vand.u32 4294901760, %v91_v13  ;;  %v87_v42 = vld [vmem:[#allocation8 + $0x20] sm:$0xff]  ;;  %v86_v48 = vld [vmem:[#allocation8 + $0x18] sm:$0xff]  ;;  %v85_v54 = vld [vmem:[#allocation8 + $0x10] sm:$0xff] }
  0x18   :  { %v698_v21 = vsub.f32 %v93_v8, %v676_v11  ;;  %102 = vmatpush.msra.mxu0 %v668_v4  ;;  %v142_v22 = vand.u32 4294901760, %v680_v14  ;;  %v148_v23 = vand.u32 4294901760, %v683_v15  ;;  %243 = vmatpush.msra.mxu2 %v680_v14  ;;  %v708_v28 = vand.u32 4294901760, %v90_v18  ;;  %v84_v59 = vld [vmem:[#allocation8 + $0x8] sm:$0xff]  ;;  %v77_v61 = vld [vmem:[#allocation7] sm:$0x3] }
  0x19   :  { %v154_v24 = vand.u32 4294901760, %v686_v16  ;;  %v160_v27 = vand.u32 4294901760, %v692_v19  ;;  %v711_v29 = vsub.f32 %v92_v12, %v688_v17  ;;  %298 = vmatpush.msra.mxu3 %v668_v4  ;;  %v166_v33 = vand.u32 4294901760, %v695_v20  ;;  %v83_v2 = vld [vmem:[#allocation8] sm:$0xff]  ;;  %v789_v8 = vld [vmem:[#allocation2] sm:$0xf] }
  0x1a   :  { %104 = vmatpush.msra.mxu0 %v670_v5  ;;  %v143_v30 = vsub.f32 %v680_v14, %v142_v22  ;;  %v149_v31 = vsub.f32 %v683_v15, %v148_v23  ;;  %246 = vmatpush.msra.mxu2 %v683_v15  ;;  %v172_v34 = vand.u32 4294901760, %v698_v21  ;;  %v727_v35 = vand.u32 4294901760, %v89_v26 }
  0x1b   :  { %v155_v32 = vsub.f32 %v686_v16, %v154_v24  ;;  %300 = vmatpush.msra.mxu3 %v670_v5  ;;  %v161_v39 = vsub.f32 %v692_v19, %v160_v27  ;;  %v735_v40 = vsub.f32 %v91_v13, %v704_v25  ;;  %v178_v41 = vand.u32 4294901760, %v711_v29 }
  0x1c   :  { %v144_v37 = vand.u32 4294901760, %v143_v30  ;;  %106 = vmatpush.msra.mxu0 %v672_v9  ;;  %v150_v38 = vand.u32 4294901760, %v149_v31  ;;  %249 = vmatpush.msra.mxu2 %v686_v16  ;;  %v167_v44 = vsub.f32 %v695_v20, %v166_v33  ;;  %v744_v45 = vand.u32 4294901760, %v88_v36 }
  0x1d   :  { %302 = vmatpush.msra.mxu3 %v672_v9  ;;  %v156_v43 = vand.u32 4294901760, %v155_v32  ;;  %v747_v46 = vsub.f32 %v90_v18, %v708_v28  ;;  %v184_v47 = vand.u32 4294901760, %v735_v40  ;;  %v162_v49 = vand.u32 4294901760, %v161_v39 }
  0x1e   :  { %145 = vmatpush.msra.mxu1 %v144_v37  ;;  %108 = vmatpush.msra.mxu0 %v674_v10  ;;  %v173_v50 = vsub.f32 %v698_v21, %v172_v34  ;;  %v756_v51 = vand.u32 4294901760, %v87_v42  ;;  %v759_v52 = vsub.f32 %v89_v26, %v727_v35  ;;  %v179_v53 = vsub.f32 %v711_v29, %v178_v41  ;;  %v799_v26 = vld [vmem:[#allocation5] sm:$0xf] }
  0x1f   :  { %252 = vmatpush.msra.mxu2 %v692_v19  ;;  %304 = vmatpush.msra.mxu3 %v674_v10  ;;  %v168_v55 = vand.u32 4294901760, %v167_v44  ;;  %v190_v56 = vand.u32 4294901760, %v747_v46  ;;  %v768_v57 = vand.u32 4294901760, %v86_v48  ;;  %v771_v58 = vsub.f32 %v88_v36, %v744_v45 }
  0x20   :  { %151 = vmatpush.msra.mxu1 %v150_v38  ;;  %110 = vmatpush.msra.mxu0 %v676_v11  ;;  %v185_v60 = vsub.f32 %v735_v40, %v184_v47  ;;  %v174_v62 = vand.u32 4294901760, %v173_v50  ;;  %v196_v63 = vand.u32 4294901760, %v759_v52  ;;  %v780_v0 = vand.u32 4294901760, %v85_v54 }
  0x21   :  { %255 = vmatpush.msra.mxu2 %v695_v20  ;;  %306 = vmatpush.msra.mxu3 %v676_v11  ;;  %v783_v1 = vsub.f32 %v87_v42, %v756_v51  ;;  %v180_v6 = vand.u32 4294901760, %v179_v53  ;;  %v785_v7 = vand.u32 4294901760, %v84_v59  ;;  %v191_v12 = vsub.f32 %v747_v46, %v190_v56 }
  0x22   :  { %157 = vmatpush.msra.mxu1 %v156_v43  ;;  %112 = vmatpush.msra.mxu0 %v688_v17  ;;  %v202_v13 = vand.u32 4294901760, %v771_v58  ;;  %v797_v18 = vsub.f32 %v86_v48, %v768_v57  ;;  %v78_v30 = vperm.slane %v77_v61, 0  ;;  %v186_v31 = vand.u32 4294901760, %v185_v60 }
  0x23   :  { %258 = vmatpush.msra.mxu2 %v698_v21  ;;  %308 = vmatpush.msra.mxu3 %v688_v17  ;;  %v801_v32 = vand.u32 4294901760, %v83_v2  ;;  %v80_v36 = vperm.slane %v77_v61, 1  ;;  %v197_v37 = vsub.f32 %v759_v52, %v196_v63  ;;  %v208_v38 = vand.u32 4294901760, %v783_v1 }
  0x24   :  { %163 = vmatpush.msra.mxu1 %v162_v49  ;;  %114 = vmatpush.msra.mxu0 %v704_v25  ;;  %v811_v39 = vsub.f32 %v85_v54, %v780_v0  ;;  %v79_v42 = vmul.f32 %v78_v30, %v789_v8  ;;  %v192_v44 = vand.u32 4294901760, %v191_v12  ;;  %v203_v48 = vsub.f32 %v771_v58, %v202_v13 }
  0x25   :  { %261 = vmatpush.msra.mxu2 %v711_v29  ;;  %310 = vmatpush.msra.mxu3 %v704_v25  ;;  %v81_v43 = vmul.f32 %v80_v36, %v799_v26  ;;  %v214_v49 = vand.u32 4294901760, %v797_v18  ;;  %v823_v50 = vsub.f32 %v84_v59, %v785_v7  ;;  %v198_v54 = vand.u32 4294901760, %v197_v37 }
  0x26   :  { %169 = vmatpush.msra.mxu1 %v168_v55  ;;  %116 = vmatpush.msra.mxu0 %v708_v28  ;;  %v209_v55 = vsub.f32 %v783_v1, %v208_v38  ;;  %v220_v60 = vand.u32 4294901760, %v811_v39  ;;  %v833_v61 = vsub.f32 %v83_v2, %v801_v32 }
  0x27   :  { %264 = vmatpush.msra.mxu2 %v735_v40  ;;  %312 = vmatpush.msra.mxu3 %v708_v28  ;;  %v82_v53 = vadd.f32 %v81_v43, %v79_v42  ;;  %v226_v12 = vand.u32 4294901760, %v823_v50 }
  0x28   :  { %175 = vmatpush.msra.mxu1 %v174_v62  ;;  %118 = vmatpush.msra.mxu0 %v727_v35  ;;  %v204_v62 = vand.u32 4294901760, %v203_v48  ;;  %v210_v30 = vand.u32 4294901760, %v209_v55  ;;  %v232_v36 = vand.u32 4294901760, %v833_v61 }
  0x29   :  { %267 = vmatpush.msra.mxu2 %v747_v46  ;;  %314 = vmatpush.msra.mxu3 %v727_v35  ;;  %v837_v59 = vand.u32 4294901760, %v82_v53  ;;  %v227_v43 = vsub.f32 %v823_v50, %v226_v12 }
  0x2a   :  { %181 = vmatpush.msra.mxu1 %v180_v6  ;;  %120 = vmatpush.msra.mxu0 %v744_v45  ;;  %v215_v6 = vsub.f32 %v797_v18, %v214_v49 }
  0x2b   :  { %270 = vmatpush.msra.mxu2 %v759_v52  ;;  %316 = vmatpush.msra.mxu3 %v744_v45  ;;  %v132_v2 = vsub.f32 %v82_v53, %v837_v59  ;;  %v233_v53 = vsub.f32 %v833_v61, %v232_v36 }
  0x2c   :  { %187 = vmatpush.msra.mxu1 %v186_v31  ;;  %122 = vmatpush.msra.mxu0 %v756_v51  ;;  %v221_v31 = vsub.f32 %v811_v39, %v220_v60  ;;  %v216_v42 = vand.u32 4294901760, %v215_v6 }
  0x2d   :  { %273 = vmatpush.msra.mxu2 %v771_v58  ;;  %318 = vmatpush.msra.mxu3 %v756_v51  ;;  %v133_v37 = vand.u32 4294901760, %v132_v2 }
  0x2e   :  { %193 = vmatpush.msra.mxu1 %v192_v44  ;;  %124 = vmatpush.msra.mxu0 %v768_v57  ;;  %v222_v48 = vand.u32 4294901760, %v221_v31 }
  0x2f   :  { %276 = vmatpush.msra.mxu2 %v783_v1  ;;  %320 = vmatpush.msra.mxu3 %v768_v57  ;;  %v134_v44 = vsub.f32 %v132_v2, %v133_v37 }
  0x30   :  { %199 = vmatpush.msra.mxu1 %v198_v54  ;;  %126 = vmatpush.msra.mxu0 %v780_v0  ;;  %v228_v54 = vand.u32 4294901760, %v227_v43 }
  0x31   :  { %279 = vmatpush.msra.mxu2 %v797_v18  ;;  %322 = vmatpush.msra.mxu3 %v780_v0  ;;  %v135_v55 = vand.u32 4294901760, %v134_v44 }
  0x32   :  { %205 = vmatpush.msra.mxu1 %v204_v62  ;;  %128 = vmatpush.msra.mxu0 %v785_v7  ;;  %v234_v62 = vand.u32 4294901760, %v233_v53 }
  0x33   :  { %282 = vmatpush.msra.mxu2 %v811_v39  ;;  %324 = vmatpush.msra.mxu3 %v785_v7 }
  0x34   :  { %211 = vmatpush.msra.mxu1 %v210_v30  ;;  %130 = vmatpush.msra.mxu0 %v801_v32 }
  0x35   :  { %285 = vmatpush.msra.mxu2 %v823_v50  ;;  %326 = vmatpush.msra.mxu3 %v801_v32 }
  0x36   :  { %337 = vmatpush.msrb.mxu0 %v142_v22  ;;  %217 = vmatpush.msra.mxu1 %v216_v42 }
  0x37   :  { %288 = vmatpush.msra.mxu2 %v833_v61  ;;  %330 = vmatmul.f32.vlgmr.msra.gmra.mxu3 %v133_v37 }
  0x38   :  { %341 = vmatpush.msrb.mxu0 %v148_v23  ;;  %223 = vmatpush.msra.mxu1 %v222_v48 }
  0x39   :  { %291 = vmatmul.f32.vlgmr.msra.gmra.mxu2 %v132_v2  ;;  %136 = vmatmul.f32.vlgmr.msra.gmra.mxu0 %v135_v55 }
  0x3a   :  { %345 = vmatpush.msrb.mxu0 %v154_v24  ;;  %229 = vmatpush.msra.mxu1 %v228_v54 }
  0x3c   :  { %349 = vmatpush.msrb.mxu0 %v160_v27  ;;  %235 = vmatpush.msra.mxu1 %v234_v62 }
  0x3d   :  { %237 = vmatmul.f32.vlgmr.msra.gmra.mxu1 %v837_v59 }
  0x3e   :  { %404 = vmatpush.msrb.mxu1 %v666_v3  ;;  %353 = vmatpush.msrb.mxu0 %v166_v33 }
  0x40   :  { %406 = vmatpush.msrb.mxu1 %v668_v4  ;;  %357 = vmatpush.msrb.mxu0 %v172_v34  ;;  %v459_v34 = vsub.f32 %v789_v8, %v799_v26 }
  0x42   :  { %408 = vmatpush.msrb.mxu1 %v670_v5  ;;  %361 = vmatpush.msrb.mxu0 %v178_v41 }
  0x44   :  { %410 = vmatpush.msrb.mxu1 %v672_v9  ;;  %365 = vmatpush.msrb.mxu0 %v184_v47 }
  0x46   :  { %412 = vmatpush.msrb.mxu1 %v674_v10  ;;  %369 = vmatpush.msrb.mxu0 %v190_v56 }
  0x48   :  { %414 = vmatpush.msrb.mxu1 %v676_v11  ;;  %373 = vmatpush.msrb.mxu0 %v196_v63 }
  0x4a   :  { %416 = vmatpush.msrb.mxu1 %v688_v17  ;;  %377 = vmatpush.msrb.mxu0 %v202_v13 }
  0x4c   :  { %418 = vmatpush.msrb.mxu1 %v704_v25  ;;  %381 = vmatpush.msrb.mxu0 %v208_v38 }
  0x4e   :  { %420 = vmatpush.msrb.mxu1 %v708_v28  ;;  %385 = vmatpush.msrb.mxu0 %v214_v49 }
  0x50   :  { %422 = vmatpush.msrb.mxu1 %v727_v35  ;;  %389 = vmatpush.msrb.mxu0 %v220_v60 }
  0x52   :  { %424 = vmatpush.msrb.mxu1 %v744_v45  ;;  %393 = vmatpush.msrb.mxu0 %v226_v12 }
  0x54   :  { %426 = vmatpush.msrb.mxu1 %v756_v51  ;;  %397 = vmatpush.msrb.mxu0 %v232_v36 }
  0x55   :  { %399 = vmatmul.f32.vlgmr.msrb.gmra.mxu0 %v837_v59 }
  0x56   :  { %428 = vmatpush.msrb.mxu1 %v768_v57 }
  0x58   :  { %430 = vmatpush.msrb.mxu1 %v780_v0 }
  0x5a   :  { %432 = vmatpush.msrb.mxu1 %v785_v7 }
  0x5c   :  { %434 = vmatpush.msrb.mxu1 %v801_v32 }
  0x5d   :  { %436 = vmatmul.f32.vlgmr.msrb.gmra.mxu1 %v837_v59 }
  0xb6   :  { %v137_v4 = vpop.f32.mrf.mxu0 }
  0xba   :  { %v238_v3 = vpop.f32.mrf.mxu1  ;;  %v331_v11 = vpop.f32.mrf.mxu3 }
  0xbb   :  { %v239_v5 = vadd.f32 %v238_v3, %v137_v4 }
  0xbc   :  { %v292_v9 = vpop.f32.mrf.mxu2 }
  0xbd   :  { %v293_v10 = vadd.f32 %v292_v9, %v239_v5 }
  0xbf   :  { %v332_v14 = vadd.f32 %v331_v11, %v293_v10 }
  0xd2   :  { %v400_v15 = vpop.f32.mrf.mxu0 }
  0xd3   :  { %v401_v16 = vadd.f32 %v400_v15, %v332_v14 }
  0xda   :  { %v437_v17 = vpop.f32.mrf.mxu1 }
  0xdb   :  { %v438_v19 = vadd.f32 %v437_v17, %v401_v16 }
  0xdd   :  { %v482_v20 = vmul.f32 -1.442695, %v438_v19 }
  0xdf   :  { %490 = vpow2.f32 %v482_v20 }
  0xe5   :  { %v491_v21 = vpop.eup %490 }
  0xe6   :  { %v443_v22 = vadd.f32 1.0, %v491_v21 }
  0xe8   :  { %492 = vrcp.f32 %v443_v22  ;;  %v455_v27 = vand.u32 2147483648, %v443_v22  ;;  %v453_v29 = vand.u32 2147483647, %v443_v22  ;;  %vm449_vm1 = vweird.f32 %v443_v22 }
  0xea   :  { %v456_v35 = vor.u32 1.1754944e-38, %v455_v27  ;;  %vm454_vm3 = vcmp.eq.f32.partialorder %v453_v29, 8.507059e+37 }
  0xee   :  { %v493_v23 = vpop.eup %492 }
  0xef   :  { %v445_v24 = vmul.f32 %v493_v23, %v443_v22  ;;  %vm450_vm0 = vweird.f32 %v493_v23 }
  0xf0   :  { %vm451_vm2 = vmor %vm449_vm1, %vm450_vm0 }
  0xf1   :  { %v446_v25 = vsub.f32 1.0, %v445_v24 }
  0xf3   :  { %v447_v28 = vmul.f32 %v493_v23, %v446_v25 }
  0xf5   :  { %v448_v33 = vadd.f32 %v493_v23, %v447_v28 }
  0xf7   :  { %v452_v40 = vsel %vm451_vm2, %v493_v23, %v448_v33 }
  0xf8   :  { %v457_v41 = vsel %vm454_vm3, %v456_v35, %v452_v40 }
  0xf9   :  { %v460_v45 = vmul.f32 %v459_v34, %v457_v41 }
  0xfb   :  { %v461_v46 = vadd.f32 %v460_v45, %v799_v26 }
  0xfd   :  { %462 = vst [vmem:[#allocation10] sm:$0xf] %v461_v46 }
  0xfe   :  { %473 = dma.vmem_to_hbm [thread:$0]  %s469_s3, 64, %s471_s11, [#allocation4]  }
  0xff   :  { %620 = dma.done.wait [#allocation4], 64  }
 0x100   :  { %621 = vsyncadd [#allocation4], 4294967232 }
 0x101   :  { %478 = vsyncpa [#allocation3], 1 }
 0x102   :  { %479 = vsyncpa [#allocation6], 1 }
 0x103   :  { %480 = vsyncpa [#allocation9], 1 }
 0x104   :  { %481 = vsyncpa [#allocation4], 1 }

</bundles_post_ra>
